<compile_context>
chip_gen: v7x
topology: tpu7x:2x2x1
jax: 0.10.0
libtpu: 0.0.40
codegen_flags: <defaults>
</compile_context>

<pallas_src>
import numpy as np
import jax
import jax.numpy as jnp
from jax.experimental import pallas as pl
from jax.experimental.pallas import tpu as pltpu


# ----------------------------------------------------------------------------
# Parameter construction (deterministic, mirrors torch / torchaudio __init__)
# ----------------------------------------------------------------------------

def hann_window(win_length: int) -> np.ndarray:
    # torch.hann_window default is periodic=True
    n = np.arange(win_length, dtype=np.float64)
    return (0.5 - 0.5 * np.cos(2.0 * np.pi * n / win_length)).astype(np.float32)


def dft_matrices(n_fft: int):
    # One-sided DFT: n_freqs = n_fft // 2 + 1
    n_freqs = n_fft // 2 + 1
    n = np.arange(n_fft, dtype=np.float64)[:, None]           # (n_fft, 1)
    k = np.arange(n_freqs, dtype=np.float64)[None, :]         # (1, n_freqs)
    ang = 2.0 * np.pi * n * k / n_fft
    return np.cos(ang).astype(np.float32), np.sin(ang).astype(np.float32)


def mel_fbanks(n_freqs: int, f_min: float, f_max: float, n_mels: int,
               sample_rate: int) -> np.ndarray:
    # torchaudio.functional.melscale_fbanks, mel_scale='htk', norm=None
    def hz_to_mel(f):
        return 2595.0 * np.log10(1.0 + f / 700.0)

    def mel_to_hz(m):
        return 700.0 * (10.0 ** (m / 2595.0) - 1.0)

    all_freqs = np.linspace(0.0, sample_rate / 2.0, n_freqs)
    m_pts = np.linspace(hz_to_mel(f_min), hz_to_mel(f_max), n_mels + 2)
    f_pts = mel_to_hz(m_pts)

    f_diff = f_pts[1:] - f_pts[:-1]                            # (n_mels+1,)
    slopes = f_pts[None, :] - all_freqs[:, None]               # (n_freqs, n_mels+2)
    down_slopes = -slopes[:, :-2] / f_diff[:-1]
    up_slopes = slopes[:, 2:] / f_diff[1:]
    fb = np.maximum(0.0, np.minimum(down_slopes, up_slopes))   # (n_freqs, n_mels)
    return fb.astype(np.float32)


def _round_up(x: int, m: int) -> int:
    return ((x + m - 1) // m) * m


def build_constants(n_fft: int, win_length: int, n_mels: int, sample_rate: int):
    """Fused, window-folded DFT matrix and zero-padded mel filterbank."""
    n_freqs = n_fft // 2 + 1
    f_pad = _round_up(n_freqs, 128)           # 201 -> 256
    m_pad = _round_up(n_mels, 128)            # 40  -> 128

    cos_m, sin_m = dft_matrices(n_fft)
    win = hann_window(win_length).astype(np.float64)[:, None]  # fold window
    w = np.zeros((n_fft, 2 * f_pad), np.float32)
    w[:, :n_freqs] = (win * cos_m).astype(np.float32)
    w[:, f_pad:f_pad + n_freqs] = (win * sin_m).astype(np.float32)

    fb = mel_fbanks(n_freqs, 0.0, sample_rate / 2.0, n_mels, sample_rate)
    fb_p = np.zeros((f_pad, m_pad), np.float32)
    fb_p[:n_freqs, :n_mels] = fb              # (f_pad, m_pad)  e.g. (256, 128)
    return w, fb_p, f_pad, m_pad


# ----------------------------------------------------------------------------
# Pallas kernel: fused (windowed) DFT matmul + power + mel projection + log10
# ----------------------------------------------------------------------------

def _logmel_kernel(frames_ref, w_ref, fb_ref, out_ref):
    f_pad = w_ref.shape[1] // 2
    frames = frames_ref[...]                                   # (TM, n_fft)
    # One MXU pass: [re | im] in a single 2*f_pad-wide result.
    y = jnp.dot(frames, w_ref[...], preferred_element_type=jnp.float32)
    re = y[:, :f_pad]                                          # 128-aligned slice
    im = y[:, f_pad:]                                          # 128-aligned slice
    power = re * re + im * im                                  # (TM, f_pad)
    # Padded freq rows of fb are zero -> padded power columns contribute 0.
    mel = jnp.dot(power, fb_ref[...], preferred_element_type=jnp.float32)
    out_ref[...] = jnp.log10(mel + 1e-6)                       # (TM, m_pad)


def logmel(x: jax.Array, *, window_length=400, hop_length=160, n_fft=400,
           n_mels=40, sample_rate=16000) -> jax.Array:
    """x: (B, L) float32 waveform -> (B, n_mels, n_frames) float32 log-mel."""
    assert window_length == n_fft, "win_length < n_fft padding not needed here"
    B, L = x.shape

    # center=True, pad_mode='reflect'
    pad = n_fft // 2
    xp = jnp.pad(x, ((0, 0), (pad, pad)), mode="reflect")

    # Frame extraction (window is folded into the DFT matrix -> no multiply).
    n_frames = 1 + L // hop_length
    idx = (jnp.arange(n_frames)[:, None] * hop_length
           + jnp.arange(n_fft)[None, :])                       # (n_frames, n_fft)
    frames = xp[:, idx].astype(jnp.float32)                    # (B, n_frames, n_fft)
    N = B * n_frames
    frames2d = frames.reshape(N, n_fft)

    # Tile the rows dimension: TM rows per grid step (512 for big inputs;
    # for tiny inputs just round up to a sublane multiple).
    TM = 512
    if N < TM:
        TM = _round_up(N, 8)
    N_pad = _round_up(N, TM)
    if N_pad != N:
        frames2d = jnp.pad(frames2d, ((0, N_pad - N), (0, 0)))

    w_np, fb_np, f_pad, m_pad = build_constants(n_fft, window_length, n_mels,
                                                sample_rate)
    w = jnp.asarray(w_np)                                      # (n_fft, 2*f_pad)
    fb = jnp.asarray(fb_np)                                    # (f_pad, m_pad)

    grid = (N_pad // TM,)
    cost = pl.CostEstimate(
        flops=2 * N_pad * n_fft * (2 * f_pad)                  # DFT matmul
              + 2 * N_pad * f_pad * m_pad                      # mel matmul
              + 3 * N_pad * f_pad + N_pad * m_pad,             # power + bias add
        transcendentals=N_pad * m_pad,                         # log10
        bytes_accessed=N_pad * n_fft * 4 + N_pad * m_pad * 4
                       + (n_fft * 2 * f_pad + f_pad * m_pad) * 4,
    )

    out2d = pl.pallas_call(
        _logmel_kernel,
        out_shape=jax.ShapeDtypeStruct((N_pad, m_pad), jnp.float32),
        grid=grid,
        in_specs=[
            pl.BlockSpec((TM, n_fft), lambda i: (i, 0)),         # streamed rows
            pl.BlockSpec((n_fft, 2 * f_pad), lambda i: (0, 0)),  # VMEM-resident
            pl.BlockSpec((f_pad, m_pad), lambda i: (0, 0)),      # VMEM-resident
        ],
        out_specs=pl.BlockSpec((TM, m_pad), lambda i: (i, 0)),
        compiler_params=pltpu.CompilerParams(
            dimension_semantics=("parallel",)),
        cost_estimate=cost,
    )(frames2d, w, fb)

    # (N_pad, m_pad) -> slice valid rows/mels -> (B, n_frames, n_mels)
    #                -> (B, n_mels, n_frames)
    out2d = out2d[:N, :n_mels]
    return out2d.reshape(B, n_frames, n_mels).transpose(0, 2, 1)


# ----------------------------------------------------------------------------
# Pure-JAX reference (full-precision matmuls) for sanity checking
# ----------------------------------------------------------------------------

def logmel_ref(x, *, window_length=400, hop_length=160, n_fft=400,
               n_mels=40, sample_rate=16000):
    B, L = x.shape
    n_freqs = n_fft // 2 + 1
    pad = n_fft // 2
    xp = jnp.pad(x, ((0, 0), (pad, pad)), mode="reflect")
    n_frames = 1 + L // hop_length
    idx = jnp.arange(n_frames)[:, None] * hop_length + jnp.arange(n_fft)[None, :]
    frames = xp[:, idx] * jnp.asarray(hann_window(window_length))
    cos_m, sin_m = dft_matrices(n_fft)
    hi = jax.lax.Precision.HIGHEST
    re = jnp.matmul(frames, jnp.asarray(cos_m), precision=hi)
    im = jnp.matmul(frames, jnp.asarray(sin_m), precision=hi)
    power = re * re + im * im
    fb = jnp.asarray(mel_fbanks(n_freqs, 0.0, sample_rate / 2.0, n_mels,
                                sample_rate))
    mel = jnp.matmul(power, fb, precision=hi)
    return jnp.log10(mel + 1e-6).transpose(0, 2, 1)


if __name__ == "__main__":
    key = jax.random.PRNGKey(0)
    B, L = 2, 1600                      # 2 batches, 0.1 s of 16 kHz audio
    x = jax.random.normal(key, (B, L), dtype=jnp.float32)

    out = jax.block_until_ready(logmel(x))
    ref = jax.block_until_ready(logmel_ref(x))

    assert out.shape == (B, 40, 1 + L // 160), out.shape
    assert jnp.allclose(out, ref, atol=5e-3, rtol=5e-3), float(
        jnp.max(jnp.abs(out - ref)))

    print("KERNEL_OK")
</pallas_src>

<mosaic_0001>
module attributes {stable_mosaic.version = 11 : i64} {
  func.func @_logmel_kernel(%arg0: i32, %arg1: memref<24x400xf32, #tpu.memory_space<vmem>>, %arg2: memref<400x512xf32, #tpu.memory_space<vmem>>, %arg3: memref<256x128xf32, #tpu.memory_space<vmem>>, %arg4: memref<24x128xf32, #tpu.memory_space<vmem>>) attributes {dimension_semantics = [#tpu.dimension_semantics<parallel>], iteration_bounds = array<i64: 1>, scalar_prefetch = 0 : i64, scratch_operands = 0 : i64, tpu.core_type = #tpu.core_type<tc>, window_params = [{transform_indices = @transform_0, window_bounds = array<i64: 24, 400>}, {pipeline_mode = #tpu.pipeline_mode<synchronous>, transform_indices = @transform_1, window_bounds = array<i64: 400, 512>}, {pipeline_mode = #tpu.pipeline_mode<synchronous>, transform_indices = @transform_2, window_bounds = array<i64: 256, 128>}, {transform_indices = @transform_3, window_bounds = array<i64: 24, 128>}]} {
    %c0 = arith.constant 0 : index
    %c0_0 = arith.constant 0 : index
    %0 = vector.load %arg1[%c0, %c0_0] : memref<24x400xf32, #tpu.memory_space<vmem>>, vector<24x400xf32>
    %c0_1 = arith.constant 0 : index
    %c0_2 = arith.constant 0 : index
    %1 = vector.load %arg2[%c0_1, %c0_2] : memref<400x512xf32, #tpu.memory_space<vmem>>, vector<400x512xf32>
    %cst = arith.constant dense<0.000000e+00> : vector<24x512xf32>
    %2 = tpu.matmul %0, %1, %cst {dimension_numbers = #tpu.dot_dimension_numbers<[1], [0], [0], [1], [0, 0, 1, 1], [], []>} : vector<24x400xf32>, vector<400x512xf32>, vector<24x512xf32> -> vector<24x512xf32>
    %3 = vector.extract_strided_slice %2 {offsets = [0, 0], sizes = [24, 256], strides = [1, 1]} : vector<24x512xf32> to vector<24x256xf32>
    %4 = vector.extract_strided_slice %2 {offsets = [0, 256], sizes = [24, 256], strides = [1, 1]} : vector<24x512xf32> to vector<24x256xf32>
    %5 = arith.mulf %3, %3 : vector<24x256xf32>
    %6 = arith.mulf %4, %4 : vector<24x256xf32>
    %7 = arith.addf %5, %6 : vector<24x256xf32>
    %c0_3 = arith.constant 0 : index
    %c0_4 = arith.constant 0 : index
    %8 = vector.load %arg3[%c0_3, %c0_4] : memref<256x128xf32, #tpu.memory_space<vmem>>, vector<256x128xf32>
    %cst_5 = arith.constant dense<0.000000e+00> : vector<24x128xf32>
    %9 = tpu.matmul %7, %8, %cst_5 {dimension_numbers = #tpu.dot_dimension_numbers<[1], [0], [0], [1], [0, 0, 1, 1], [], []>} : vector<24x256xf32>, vector<256x128xf32>, vector<24x128xf32> -> vector<24x128xf32>
    %cst_6 = arith.constant 9.99999997E-7 : f32
    %10 = vector.broadcast %cst_6 : f32 to vector<24x128xf32>
    %11 = arith.addf %9, %10 : vector<24x128xf32>
    %12 = math.log %11 : vector<24x128xf32>
    %cst_7 = arith.constant 0.434294492 : f32
    %13 = vector.broadcast %cst_7 : f32 to vector<24x128xf32>
    %14 = arith.mulf %12, %13 : vector<24x128xf32>
    %c0_8 = arith.constant 0 : index
    %c0_9 = arith.constant 0 : index
    %15 = vector.load %arg4[%c0_8, %c0_9] : memref<24x128xf32, #tpu.memory_space<vmem>>, vector<24x128xf32>
    tpu.vector_store %arg4[%c0_8, %c0_9], %14 {strides = array<i32>} : memref<24x128xf32, #tpu.memory_space<vmem>>, vector<24x128xf32>,
    return
  }
  func.func @transform_0(%arg0: i32) -> (i32, i32) {
    %c0_i32 = arith.constant 0 : i32
    %c0_i32_0 = arith.constant 0 : i32
    return %arg0, %c0_i32 : i32, i32
  }
  func.func @transform_1(%arg0: i32) -> (i32, i32) {
    %c0_i32 = arith.constant 0 : i32
    %c0_i32_0 = arith.constant 0 : i32
    %c0_i32_1 = arith.constant 0 : i32
    return %c0_i32, %c0_i32_0 : i32, i32
  }
  func.func @transform_2(%arg0: i32) -> (i32, i32) {
    %c0_i32 = arith.constant 0 : i32
    %c0_i32_0 = arith.constant 0 : i32
    %c0_i32_1 = arith.constant 0 : i32
    return %c0_i32, %c0_i32_0 : i32, i32
  }
  func.func @transform_3(%arg0: i32) -> (i32, i32) {
    %c0_i32 = arith.constant 0 : i32
    %c0_i32_0 = arith.constant 0 : i32
    return %arg0, %c0_i32 : i32, i32
  }
}

</mosaic_0001>

<bundles_post_ra>
// kernel: tpu_custom_call.1
= control target key start
LH: loop header
LB: loop body
LE: loop exit
PB: predicated region body
PF: predicated region fallthrough
CT: control target
= control target key end

     0   :  { %8 = vsyncpa [#allocation3], 0  ;;  %s1280_s0 = inlined_call_operand.hbm [shape: f32[24,400], index: 0, kind: input, shape index: {}]   ;;  %s1281_s1 = inlined_call_operand.hbm [shape: f32[400,512], index: 1, kind: input, shape index: {}]   ;;  %s1282_s2 = inlined_call_operand.hbm [shape: f32[256,128], index: 2, kind: input, shape index: {}]   ;;  %s1283_s3 = inlined_call_operand.hbm [shape: f32[24,128], index: 3, kind: output, shape index: {}]  }
   0x1   :  { %9 = vsyncpa [#allocation6], 0 }
   0x2   :  { %10 = vsyncpa [#allocation4], 0  ;;  %s1185_s12 = smov [#allocation5]   ;;  %s1186_s14 = smov [#allocation2]  }
   0x3   :  { %s28_s13 = sshll.u32 %s1185_s12, 4  ;;  %s16_s15 = sshll.u32 %s1186_s14, 4  ;;  %s29_s13 = int_to_ptr.vmem [resolvable:$true] %s28_s13  ;;  %s1213_s15 = int_to_ptr.vmem [resolvable:$true] %s16_s15 }
   0x4   :  { %s1091_s18 = scalar_lea.hbm %s1281_s1, 25600 }
   0x5   :  { %p1092_p0 = scmp.ne.s32.totalorder %s1281_s1, %s1091_s18  ;;  %p1095_p1 = scmp.lt.u32.totalorder %s1091_s18, %s1281_s1 }
   0x7   :  { %p1097_p2 = pnand %p1095_p1, %p1092_p0 }
   0x9   :  { %1100 = shalt.err (!%p1097_p2)
}
   0xa   :  { %s1101_s23 = scalar_lea.vmem %s29_s13, 25600  ;;  %p1106_p4 = scmp.lt.s32.totalorder %s29_s13, %s29_s13 }
   0xb   :  { %p1102_p3 = scmp.ne.s32.totalorder %s29_s13, %s1101_s23  ;;  %p1107_p5 = scmp.lt.s32.totalorder %s1101_s23, %s1101_s23 }
   0xd   :  { %p1108_p6 = por %p1107_p5, %p1106_p4 }
   0xf   :  { %p1109_p7 = pnand %p1108_p6, %p1102_p3 }
  0x11   :  { %1112 = shalt.err (!%p1109_p7)
}
  0x12   :  { %s1187_s24 = smov 512   ;;  %s1188_s25 = smov 32  }
  0x13   :  { %34 = dma.hbm_to_vmem [thread:$0]  %s1281_s1, 25600, %s29_s13, [#allocation6], %s1187_s24, %s1187_s24, %s1188_s25  }
  0x14   :  { %s1113_s30 = scalar_lea.hbm %s1280_s0, 1536 }
  0x15   :  { %p1114_p8 = scmp.ne.s32.totalorder %s1280_s0, %s1113_s30  ;;  %p1117_p9 = scmp.lt.u32.totalorder %s1113_s30, %s1280_s0 }
  0x17   :  { %p1119_p10 = pnand %p1117_p9, %p1114_p8 }
  0x19   :  { %1122 = shalt.err (!%p1119_p10)
}
  0x1a   :  { %s1123_s8 = scalar_lea.vmem %s1213_s15, 1536  ;;  %p1128_p12 = scmp.lt.s32.totalorder %s1213_s15, %s1213_s15 }
  0x1b   :  { %p1124_p11 = scmp.ne.s32.totalorder %s1213_s15, %s1123_s8  ;;  %p1129_p13 = scmp.lt.s32.totalorder %s1123_s8, %s1123_s8 }
  0x1d   :  { %p1130_p0 = por %p1129_p13, %p1128_p12 }
  0x1f   :  { %p1131_p1 = pnand %p1130_p0, %p1124_p11 }
  0x21   :  { %1134 = shalt.err (!%p1131_p1)
}
  0x22   :  { %22 = dma.hbm_to_vmem [thread:$0]  %s1280_s0, 1536, %s1213_s15, [#allocation3], %s1187_s24, %s1187_s24, %s1188_s25  }
  0x23   :  { %s1189_s10 = smov [#allocation7]   ;;  %s1135_s14 = scalar_lea.hbm %s1282_s2, 4096 }
  0x24   :  { %s40_s11 = sshll.u32 %s1189_s10, 4  ;;  %p1136_p2 = scmp.ne.s32.totalorder %s1282_s2, %s1135_s14  ;;  %s41_s11 = int_to_ptr.vmem [resolvable:$true] %s40_s11 }
  0x25   :  { %p1139_p3 = scmp.lt.u32.totalorder %s1135_s14, %s1282_s2 }
  0x27   :  { %p1141_p4 = pnand %p1139_p3, %p1136_p2 }
  0x29   :  { %1144 = shalt.err (!%p1141_p4)
}
  0x2a   :  { %s1145_s20 = scalar_lea.vmem %s41_s11, 4096  ;;  %p1150_p6 = scmp.lt.s32.totalorder %s41_s11, %s41_s11 }
  0x2b   :  { %p1146_p5 = scmp.ne.s32.totalorder %s41_s11, %s1145_s20  ;;  %p1151_p7 = scmp.lt.s32.totalorder %s1145_s20, %s1145_s20 }
  0x2d   :  { %p1152_p8 = por %p1151_p7, %p1150_p6 }
  0x2f   :  { %p1153_p9 = pnand %p1152_p8, %p1146_p5 }
  0x31   :  { %1156 = shalt.err (!%p1153_p9)
}
  0x32   :  { %s1190_s0 = smov 128   ;;  %s1191_s15 = smov 8  }
  0x33   :  { %46 = dma.hbm_to_vmem [thread:$0]  %s1282_s2, 4096, %s41_s11, [#allocation6], %s1190_s0, %s1190_s0, %s1191_s15  }
  0x34   :  { %1179 = dma.done.wait [#allocation3], 1536  }
  0x35   :  { %1180 = vsyncadd [#allocation3], 4294965760 }
  0x36   :  { %1181 = dma.done.wait [#allocation6], 29696  }
  0x37   :  { %1182 = vsyncadd [#allocation6], 4294937600  ;;  %v69_v0 = vld [vmem:[#allocation5 + $0x8] sm:$0xff]  ;;  %v71_v2 = vld [vmem:[#allocation5 + $0x18] sm:$0xff]  ;;  %vm268_vm0 = vcmask 130048   ;;  %s1192_s2 = smov [#allocation8]  }
  0x38   :  { %v73_v1 = vld [vmem:[#allocation5 + $0x28] sm:$0xff]  ;;  %v75_v4 = vld [vmem:[#allocation5 + $0x38] sm:$0xff]  ;;  %v68_v5 = vld [vmem:[#allocation5] sm:$0xff]  ;;  %s757_s23 = sshll.u32 %s1192_s2, 4  ;;  %s758_s23 = int_to_ptr.vmem [resolvable:$true] %s757_s23 }
  0x39   :  { %v817_v3 = vpack.c.bf16 %v73_v1, %v69_v0  ;;  %v72_v6 = vld [vmem:[#allocation5 + $0x20] sm:$0xff]  ;;  %v917_v7 = vpack.c.bf16 %v75_v4, %v71_v2  ;;  %v70_v9 = vld [vmem:[#allocation5 + $0x10] sm:$0xff]  ;;  %v77_v11 = vld [vmem:[#allocation5 + $0x48] sm:$0xff]  ;;  %s1157_s24 = scalar_lea.vmem %s758_s23, 384  ;;  %p1162_p11 = scmp.lt.s32.totalorder %s758_s23, %s758_s23 }
  0x3a   :  { %v819_v8 = vpack.c.bf16 %v72_v6, %v68_v5  ;;  %v74_v10 = vld [vmem:[#allocation5 + $0x30] sm:$0xff]  ;;  %v81_v13 = vld [vmem:[#allocation5 + $0x68] sm:$0xff]  ;;  %v79_v14 = vld [vmem:[#allocation5 + $0x58] sm:$0xff]  ;;  %p1158_p10 = scmp.ne.s32.totalorder %s758_s23, %s1157_s24  ;;  %p1163_p12 = scmp.lt.s32.totalorder %s1157_s24, %s1157_s24 }
  0x3b   :  { %818 = vmatprep.subr.bf16.mxu0 %v817_v3  ;;  %v919_v12 = vpack.c.bf16 %v74_v10, %v70_v9  ;;  %v83_v15 = vld [vmem:[#allocation5 + $0x78] sm:$0xff]  ;;  %918 = vmatprep.subr.bf16.mxu1 %v917_v7  ;;  %v821_v16 = vpack.c.bf16 %v81_v13, %v77_v11  ;;  %v76_v18 = vld [vmem:[#allocation5 + $0x40] sm:$0xff]  ;;  %v78_v20 = vld [vmem:[#allocation5 + $0x50] sm:$0xff] }
  0x3c   :  { %820 = vmatpush1.bf16.msra.mxu0 %v819_v8  ;;  %v921_v17 = vpack.c.bf16 %v83_v15, %v79_v14  ;;  %v80_v19 = vld [vmem:[#allocation5 + $0x60] sm:$0xff]  ;;  %v82_v22 = vld [vmem:[#allocation5 + $0x70] sm:$0xff]  ;;  %v85_v23 = vld [vmem:[#allocation5 + $0x88] sm:$0xff]  ;;  %p1164_p13 = por %p1163_p12, %p1162_p11 }
  0x3d   :  { %920 = vmatpush1.bf16.msra.mxu1 %v919_v12  ;;  %v823_v21 = vpack.c.bf16 %v80_v19, %v76_v18  ;;  %v89_v24 = vld [vmem:[#allocation5 + $0xa8] sm:$0xff]  ;;  %822 = vmatprep.subr.bf16.mxu0 %v821_v16  ;;  %v923_v25 = vpack.c.bf16 %v82_v22, %v78_v20  ;;  %v87_v27 = vld [vmem:[#allocation5 + $0x98] sm:$0xff]  ;;  %v84_v29 = vld [vmem:[#allocation5 + $0x80] sm:$0xff] }
  0x3e   :  { %922 = vmatprep.subr.bf16.mxu1 %v921_v17  ;;  %v825_v26 = vpack.c.bf16 %v89_v24, %v85_v23  ;;  %v91_v28 = vld [vmem:[#allocation5 + $0xb8] sm:$0xff]  ;;  %v88_v31 = vld [vmem:[#allocation5 + $0xa0] sm:$0xff]  ;;  %v86_v32 = vld [vmem:[#allocation5 + $0x90] sm:$0xff]  ;;  %p1165_p0 = pnand %p1164_p13, %p1158_p10 }
  0x3f   :  { %v925_v30 = vpack.c.bf16 %v91_v28, %v87_v27  ;;  %v90_v33 = vld [vmem:[#allocation5 + $0xb0] sm:$0xff]  ;;  %v827_v34 = vpack.c.bf16 %v88_v31, %v84_v29  ;;  %v93_v35 = vld [vmem:[#allocation5 + $0xc8] sm:$0xff]  ;;  %v95_v37 = vld [vmem:[#allocation5 + $0xd8] sm:$0xff] }
  0x40   :  { %824 = vmatpush1.bf16.msra.mxu0 %v823_v21  ;;  %v97_v36 = vld [vmem:[#allocation5 + $0xe8] sm:$0xff]  ;;  %v927_v38 = vpack.c.bf16 %v90_v33, %v86_v32  ;;  %v99_v40 = vld [vmem:[#allocation5 + $0xf8] sm:$0xff]  ;;  %v92_v41 = vld [vmem:[#allocation5 + $0xc0] sm:$0xff] }
  0x41   :  { %924 = vmatpush1.bf16.msra.mxu1 %v923_v25  ;;  %826 = vmatprep.subr.bf16.mxu0 %v825_v26  ;;  %v829_v39 = vpack.c.bf16 %v97_v36, %v93_v35  ;;  %v96_v42 = vld [vmem:[#allocation5 + $0xe0] sm:$0xff]  ;;  %v929_v43 = vpack.c.bf16 %v99_v40, %v95_v37  ;;  %v94_v44 = vld [vmem:[#allocation5 + $0xd0] sm:$0xff]  ;;  %v101_v46 = vld [vmem:[#allocation5 + $0x108] sm:$0xff] }
  0x42   :  { %926 = vmatprep.subr.bf16.mxu1 %v925_v30  ;;  %v98_v45 = vld [vmem:[#allocation5 + $0xf0] sm:$0xff]  ;;  %v105_v47 = vld [vmem:[#allocation5 + $0x128] sm:$0xff]  ;;  %v103_v48 = vld [vmem:[#allocation5 + $0x118] sm:$0xff]  ;;  %v831_v50 = vpack.c.bf16 %v96_v42, %v92_v41 }
  0x43   :  { %v107_v49 = vld [vmem:[#allocation5 + $0x138] sm:$0xff]  ;;  %v931_v51 = vpack.c.bf16 %v98_v45, %v94_v44  ;;  %v833_v52 = vpack.c.bf16 %v105_v47, %v101_v46  ;;  %v100_v53 = vld [vmem:[#allocation5 + $0x100] sm:$0xff]  ;;  %v102_v55 = vld [vmem:[#allocation5 + $0x110] sm:$0xff] }
  0x44   :  { %828 = vmatpush1.bf16.msra.mxu0 %v827_v34  ;;  %v104_v54 = vld [vmem:[#allocation5 + $0x120] sm:$0xff]  ;;  %v933_v56 = vpack.c.bf16 %v107_v49, %v103_v48  ;;  %v106_v57 = vld [vmem:[#allocation5 + $0x130] sm:$0xff]  ;;  %v109_v58 = vld [vmem:[#allocation5 + $0x148] sm:$0xff] }
  0x45   :  { %928 = vmatpush1.bf16.msra.mxu1 %v927_v38  ;;  %830 = vmatprep.subr.bf16.mxu0 %v829_v39  ;;  %v113_v59 = vld [vmem:[#allocation5 + $0x168] sm:$0xff]  ;;  %v111_v60 = vld [vmem:[#allocation5 + $0x158] sm:$0xff]  ;;  %v835_v62 = vpack.c.bf16 %v104_v54, %v100_v53  ;;  %v935_v63 = vpack.c.bf16 %v106_v57, %v102_v55  ;;  %v108_v1 = vld [vmem:[#allocation5 + $0x140] sm:$0xff] }
  0x46   :  { %930 = vmatprep.subr.bf16.mxu1 %v929_v43  ;;  %v115_v61 = vld [vmem:[#allocation5 + $0x178] sm:$0xff]  ;;  %v837_v0 = vpack.c.bf16 %v113_v59, %v109_v58  ;;  %v112_v2 = vld [vmem:[#allocation5 + $0x160] sm:$0xff]  ;;  %v110_v3 = vld [vmem:[#allocation5 + $0x150] sm:$0xff] }
  0x47   :  { %v937_v4 = vpack.c.bf16 %v115_v61, %v111_v60  ;;  %v114_v5 = vld [vmem:[#allocation5 + $0x170] sm:$0xff]  ;;  %v117_v6 = vld [vmem:[#allocation5 + $0x188] sm:$0xff]  ;;  %v119_v8 = vld [vmem:[#allocation5 + $0x198] sm:$0xff]  ;;  %v839_v10 = vpack.c.bf16 %v112_v2, %v108_v1 }
  0x48   :  { %832 = vmatpush1.bf16.msra.mxu0 %v831_v50  ;;  %v121_v7 = vld [vmem:[#allocation5 + $0x1a8] sm:$0xff]  ;;  %v123_v9 = vld [vmem:[#allocation5 + $0x1b8] sm:$0xff]  ;;  %v939_v11 = vpack.c.bf16 %v114_v5, %v110_v3  ;;  %v116_v13 = vld [vmem:[#allocation5 + $0x180] sm:$0xff] }
  0x49   :  { %932 = vmatpush1.bf16.msra.mxu1 %v931_v51  ;;  %834 = vmatprep.subr.bf16.mxu0 %v833_v52  ;;  %v841_v12 = vpack.c.bf16 %v121_v7, %v117_v6  ;;  %v120_v14 = vld [vmem:[#allocation5 + $0x1a0] sm:$0xff]  ;;  %v118_v15 = vld [vmem:[#allocation5 + $0x190] sm:$0xff]  ;;  %v941_v16 = vpack.c.bf16 %v123_v9, %v119_v8  ;;  %v125_v18 = vld [vmem:[#allocation5 + $0x1c8] sm:$0xff] }
  0x4a   :  { %934 = vmatprep.subr.bf16.mxu1 %v933_v56  ;;  %v122_v17 = vld [vmem:[#allocation5 + $0x1b0] sm:$0xff]  ;;  %v129_v19 = vld [vmem:[#allocation5 + $0x1e8] sm:$0xff]  ;;  %v127_v20 = vld [vmem:[#allocation5 + $0x1d8] sm:$0xff]  ;;  %v843_v22 = vpack.c.bf16 %v120_v14, %v116_v13 }
  0x4b   :  { %v131_v21 = vld [vmem:[#allocation5 + $0x1f8] sm:$0xff]  ;;  %v943_v23 = vpack.c.bf16 %v122_v17, %v118_v15  ;;  %v845_v24 = vpack.c.bf16 %v129_v19, %v125_v18  ;;  %v124_v25 = vld [vmem:[#allocation5 + $0x1c0] sm:$0xff]  ;;  %v126_v27 = vld [vmem:[#allocation5 + $0x1d0] sm:$0xff] }
  0x4c   :  { %836 = vmatpush1.bf16.msra.mxu0 %v835_v62  ;;  %v128_v26 = vld [vmem:[#allocation5 + $0x1e0] sm:$0xff]  ;;  %v945_v28 = vpack.c.bf16 %v131_v21, %v127_v20  ;;  %v130_v29 = vld [vmem:[#allocation5 + $0x1f0] sm:$0xff]  ;;  %v133_v30 = vld [vmem:[#allocation5 + $0x208] sm:$0xff] }
  0x4d   :  { %936 = vmatpush1.bf16.msra.mxu1 %v935_v63  ;;  %838 = vmatprep.subr.bf16.mxu0 %v837_v0  ;;  %v137_v31 = vld [vmem:[#allocation5 + $0x228] sm:$0xff]  ;;  %v135_v32 = vld [vmem:[#allocation5 + $0x218] sm:$0xff]  ;;  %v847_v34 = vpack.c.bf16 %v128_v26, %v124_v25  ;;  %v947_v35 = vpack.c.bf16 %v130_v29, %v126_v27  ;;  %v132_v37 = vld [vmem:[#allocation5 + $0x200] sm:$0xff] }
  0x4e   :  { %938 = vmatprep.subr.bf16.mxu1 %v937_v4  ;;  %v139_v33 = vld [vmem:[#allocation5 + $0x238] sm:$0xff]  ;;  %v849_v36 = vpack.c.bf16 %v137_v31, %v133_v30  ;;  %v136_v38 = vld [vmem:[#allocation5 + $0x220] sm:$0xff]  ;;  %v134_v39 = vld [vmem:[#allocation5 + $0x210] sm:$0xff] }
  0x4f   :  { %v949_v40 = vpack.c.bf16 %v139_v33, %v135_v32  ;;  %v138_v41 = vld [vmem:[#allocation5 + $0x230] sm:$0xff]  ;;  %v141_v42 = vld [vmem:[#allocation5 + $0x248] sm:$0xff]  ;;  %v143_v44 = vld [vmem:[#allocation5 + $0x258] sm:$0xff]  ;;  %v851_v46 = vpack.c.bf16 %v136_v38, %v132_v37 }
  0x50   :  { %840 = vmatpush1.bf16.msra.mxu0 %v839_v10  ;;  %v145_v43 = vld [vmem:[#allocation5 + $0x268] sm:$0xff]  ;;  %v147_v45 = vld [vmem:[#allocation5 + $0x278] sm:$0xff]  ;;  %v951_v47 = vpack.c.bf16 %v138_v41, %v134_v39  ;;  %v140_v49 = vld [vmem:[#allocation5 + $0x240] sm:$0xff] }
  0x51   :  { %940 = vmatpush1.bf16.msra.mxu1 %v939_v11  ;;  %842 = vmatprep.subr.bf16.mxu0 %v841_v12  ;;  %v853_v48 = vpack.c.bf16 %v145_v43, %v141_v42  ;;  %v144_v50 = vld [vmem:[#allocation5 + $0x260] sm:$0xff]  ;;  %v142_v51 = vld [vmem:[#allocation5 + $0x250] sm:$0xff]  ;;  %v953_v52 = vpack.c.bf16 %v147_v45, %v143_v44  ;;  %v149_v54 = vld [vmem:[#allocation5 + $0x288] sm:$0xff] }
  0x52   :  { %942 = vmatprep.subr.bf16.mxu1 %v941_v16  ;;  %v146_v53 = vld [vmem:[#allocation5 + $0x270] sm:$0xff]  ;;  %v153_v55 = vld [vmem:[#allocation5 + $0x2a8] sm:$0xff]  ;;  %v151_v56 = vld [vmem:[#allocation5 + $0x298] sm:$0xff]  ;;  %v855_v58 = vpack.c.bf16 %v144_v50, %v140_v49 }
  0x53   :  { %v155_v57 = vld [vmem:[#allocation5 + $0x2b8] sm:$0xff]  ;;  %v955_v59 = vpack.c.bf16 %v146_v53, %v142_v51  ;;  %v857_v60 = vpack.c.bf16 %v153_v55, %v149_v54  ;;  %v148_v61 = vld [vmem:[#allocation5 + $0x280] sm:$0xff]  ;;  %v150_v63 = vld [vmem:[#allocation5 + $0x290] sm:$0xff] }
  0x54   :  { %844 = vmatpush1.bf16.msra.mxu0 %v843_v22  ;;  %v152_v62 = vld [vmem:[#allocation5 + $0x2a0] sm:$0xff]  ;;  %v957_v0 = vpack.c.bf16 %v155_v57, %v151_v56  ;;  %v154_v1 = vld [vmem:[#allocation5 + $0x2b0] sm:$0xff]  ;;  %v157_v2 = vld [vmem:[#allocation5 + $0x2c8] sm:$0xff] }
  0x55   :  { %944 = vmatpush1.bf16.msra.mxu1 %v943_v23  ;;  %846 = vmatprep.subr.bf16.mxu0 %v845_v24  ;;  %v161_v3 = vld [vmem:[#allocation5 + $0x2e8] sm:$0xff]  ;;  %v159_v4 = vld [vmem:[#allocation5 + $0x2d8] sm:$0xff]  ;;  %v859_v6 = vpack.c.bf16 %v152_v62, %v148_v61  ;;  %v156_v7 = vld [vmem:[#allocation5 + $0x2c0] sm:$0xff]  ;;  %v959_v8 = vpack.c.bf16 %v154_v1, %v150_v63 }
  0x56   :  { %946 = vmatprep.subr.bf16.mxu1 %v945_v28  ;;  %v163_v5 = vld [vmem:[#allocation5 + $0x2f8] sm:$0xff]  ;;  %v861_v9 = vpack.c.bf16 %v161_v3, %v157_v2  ;;  %v160_v10 = vld [vmem:[#allocation5 + $0x2e0] sm:$0xff]  ;;  %v158_v11 = vld [vmem:[#allocation5 + $0x2d0] sm:$0xff] }
  0x57   :  { %v162_v12 = vld [vmem:[#allocation5 + $0x2f0] sm:$0xff]  ;;  %v961_v13 = vpack.c.bf16 %v163_v5, %v159_v4  ;;  %v165_v14 = vld [vmem:[#allocation5 + $0x308] sm:$0xff]  ;;  %v167_v17 = vld [vmem:[#allocation5 + $0x318] sm:$0xff]  ;;  %v863_v19 = vpack.c.bf16 %v160_v10, %v156_v7 }
  0x58   :  { %848 = vmatpush1.bf16.msra.mxu0 %v847_v34  ;;  %v169_v15 = vld [vmem:[#allocation5 + $0x328] sm:$0xff]  ;;  %v171_v18 = vld [vmem:[#allocation5 + $0x338] sm:$0xff]  ;;  %v963_v20 = vpack.c.bf16 %v162_v12, %v158_v11  ;;  %v164_v22 = vld [vmem:[#allocation5 + $0x300] sm:$0xff] }
  0x59   :  { %948 = vmatpush1.bf16.msra.mxu1 %v947_v35  ;;  %850 = vmatprep.subr.bf16.mxu0 %v849_v36  ;;  %v57_v16 = vld [vmem:[#allocation2 + $0x8] sm:$0xff]  ;;  %v865_v21 = vpack.c.bf16 %v169_v15, %v165_v14  ;;  %v168_v23 = vld [vmem:[#allocation5 + $0x320] sm:$0xff]  ;;  %v166_v24 = vld [vmem:[#allocation5 + $0x310] sm:$0xff]  ;;  %v965_v25 = vpack.c.bf16 %v171_v18, %v167_v17 }
  0x5a   :  { %950 = vmatprep.subr.bf16.mxu1 %v949_v40  ;;  %342 = vmatprep.mubr.f32.mxu0 %v57_v16  ;;  %v170_v26 = vld [vmem:[#allocation5 + $0x330] sm:$0xff]  ;;  %v173_v27 = vld [vmem:[#allocation5 + $0x348] sm:$0xff]  ;;  %v175_v29 = vld [vmem:[#allocation5 + $0x358] sm:$0xff]  ;;  %v867_v31 = vpack.c.bf16 %v168_v23, %v164_v22 }
  0x5b   :  { %508 = vmatprep.mubr.f32.mxu1 %v57_v16  ;;  %v177_v28 = vld [vmem:[#allocation5 + $0x368] sm:$0xff]  ;;  %v179_v30 = vld [vmem:[#allocation5 + $0x378] sm:$0xff]  ;;  %v967_v32 = vpack.c.bf16 %v170_v26, %v166_v24  ;;  %v172_v34 = vld [vmem:[#allocation5 + $0x340] sm:$0xff] }
  0x5c   :  { %852 = vmatpush1.bf16.msra.mxu0 %v851_v46  ;;  %v869_v33 = vpack.c.bf16 %v177_v28, %v173_v27  ;;  %v176_v35 = vld [vmem:[#allocation5 + $0x360] sm:$0xff]  ;;  %v174_v36 = vld [vmem:[#allocation5 + $0x350] sm:$0xff]  ;;  %v969_v37 = vpack.c.bf16 %v179_v30, %v175_v29  ;;  %v181_v39 = vld [vmem:[#allocation5 + $0x388] sm:$0xff] }
  0x5d   :  { %952 = vmatpush1.bf16.msra.mxu1 %v951_v47  ;;  %854 = vmatprep.subr.bf16.mxu0 %v853_v48  ;;  %v178_v38 = vld [vmem:[#allocation5 + $0x370] sm:$0xff]  ;;  %v185_v40 = vld [vmem:[#allocation5 + $0x3a8] sm:$0xff]  ;;  %v183_v41 = vld [vmem:[#allocation5 + $0x398] sm:$0xff]  ;;  %v871_v43 = vpack.c.bf16 %v176_v35, %v172_v34 }
  0x5e   :  { %954 = vmatprep.subr.bf16.mxu1 %v953_v52  ;;  %v187_v42 = vld [vmem:[#allocation5 + $0x3b8] sm:$0xff]  ;;  %v971_v44 = vpack.c.bf16 %v178_v38, %v174_v36  ;;  %v873_v45 = vpack.c.bf16 %v185_v40, %v181_v39  ;;  %v180_v46 = vld [vmem:[#allocation5 + $0x380] sm:$0xff]  ;;  %v182_v48 = vld [vmem:[#allocation5 + $0x390] sm:$0xff] }
  0x5f   :  { %v184_v47 = vld [vmem:[#allocation5 + $0x3a0] sm:$0xff]  ;;  %v973_v49 = vpack.c.bf16 %v187_v42, %v183_v41  ;;  %v186_v50 = vld [vmem:[#allocation5 + $0x3b0] sm:$0xff]  ;;  %v189_v51 = vld [vmem:[#allocation5 + $0x3c8] sm:$0xff] }
  0x60   :  { %856 = vmatpush1.bf16.msra.mxu0 %v855_v58  ;;  %v193_v52 = vld [vmem:[#allocation5 + $0x3e8] sm:$0xff]  ;;  %v191_v53 = vld [vmem:[#allocation5 + $0x3d8] sm:$0xff]  ;;  %v875_v55 = vpack.c.bf16 %v184_v47, %v180_v46  ;;  %v975_v56 = vpack.c.bf16 %v186_v50, %v182_v48  ;;  %v188_v58 = vld [vmem:[#allocation5 + $0x3c0] sm:$0xff] }
  0x61   :  { %956 = vmatpush1.bf16.msra.mxu1 %v955_v59  ;;  %858 = vmatprep.subr.bf16.mxu0 %v857_v60  ;;  %v195_v54 = vld [vmem:[#allocation5 + $0x3f8] sm:$0xff]  ;;  %v877_v57 = vpack.c.bf16 %v193_v52, %v189_v51  ;;  %v192_v59 = vld [vmem:[#allocation5 + $0x3e0] sm:$0xff]  ;;  %v190_v60 = vld [vmem:[#allocation5 + $0x3d0] sm:$0xff] }
  0x62   :  { %958 = vmatprep.subr.bf16.mxu1 %v957_v0  ;;  %v977_v61 = vpack.c.bf16 %v195_v54, %v191_v53  ;;  %v194_v62 = vld [vmem:[#allocation5 + $0x3f0] sm:$0xff]  ;;  %v197_v63 = vld [vmem:[#allocation5 + $0x408] sm:$0xff]  ;;  %v199_v1 = vld [vmem:[#allocation5 + $0x418] sm:$0xff]  ;;  %v879_v3 = vpack.c.bf16 %v192_v59, %v188_v58 }
  0x63   :  { %v201_v0 = vld [vmem:[#allocation5 + $0x428] sm:$0xff]  ;;  %v203_v2 = vld [vmem:[#allocation5 + $0x438] sm:$0xff]  ;;  %v979_v4 = vpack.c.bf16 %v194_v62, %v190_v60  ;;  %v200_v7 = vld [vmem:[#allocation5 + $0x420] sm:$0xff] }
  0x64   :  { %860 = vmatpush1.bf16.msra.mxu0 %v859_v6  ;;  %v881_v5 = vpack.c.bf16 %v201_v0, %v197_v63  ;;  %v196_v6 = vld [vmem:[#allocation5 + $0x400] sm:$0xff]  ;;  %v202_v10 = vld [vmem:[#allocation5 + $0x430] sm:$0xff]  ;;  %v205_v11 = vld [vmem:[#allocation5 + $0x448] sm:$0xff] }
  0x65   :  { %960 = vmatpush1.bf16.msra.mxu1 %v959_v8  ;;  %862 = vmatprep.subr.bf16.mxu0 %v861_v9  ;;  %v198_v8 = vld [vmem:[#allocation5 + $0x410] sm:$0xff]  ;;  %v981_v9 = vpack.c.bf16 %v203_v2, %v199_v1  ;;  %v209_v12 = vld [vmem:[#allocation5 + $0x468] sm:$0xff]  ;;  %v211_v14 = vld [vmem:[#allocation5 + $0x478] sm:$0xff]  ;;  %v883_v16 = vpack.c.bf16 %v200_v7, %v196_v6 }
  0x66   :  { %962 = vmatprep.subr.bf16.mxu1 %v961_v13  ;;  %v207_v13 = vld [vmem:[#allocation5 + $0x458] sm:$0xff]  ;;  %v56_v15 = vld [vmem:[#allocation2] sm:$0xff]  ;;  %v983_v17 = vpack.c.bf16 %v202_v10, %v198_v8  ;;  %v885_v18 = vpack.c.bf16 %v209_v12, %v205_v11  ;;  %v210_v23 = vld [vmem:[#allocation5 + $0x470] sm:$0xff] }
  0x67   :  { %v985_v22 = vpack.c.bf16 %v211_v14, %v207_v13  ;;  %v213_v24 = vld [vmem:[#allocation5 + $0x488] sm:$0xff]  ;;  %v215_v26 = vld [vmem:[#allocation5 + $0x498] sm:$0xff]  ;;  %v60_v30 = vld [vmem:[#allocation2 + $0x20] sm:$0xff] }
  0x68   :  { %864 = vmatpush1.bf16.msra.mxu0 %v863_v19  ;;  %v204_v19 = vld [vmem:[#allocation5 + $0x440] sm:$0xff]  ;;  %v219_v27 = vld [vmem:[#allocation5 + $0x4b8] sm:$0xff]  ;;  %v61_v28 = vld [vmem:[#allocation2 + $0x28] sm:$0xff] }
  0x69   :  { %964 = vmatpush1.bf16.msra.mxu1 %v963_v20  ;;  %866 = vmatprep.subr.bf16.mxu0 %v865_v21  ;;  %v208_v20 = vld [vmem:[#allocation5 + $0x460] sm:$0xff]  ;;  %v206_v21 = vld [vmem:[#allocation5 + $0x450] sm:$0xff]  ;;  %v989_v36 = vpack.c.bf16 %v219_v27, %v215_v26  ;;  %v221_v38 = vld [vmem:[#allocation5 + $0x4c8] sm:$0xff] }
  0x6a   :  { %966 = vmatprep.subr.bf16.mxu1 %v965_v25  ;;  %v217_v25 = vld [vmem:[#allocation5 + $0x4a8] sm:$0xff]  ;;  %v887_v29 = vpack.c.bf16 %v208_v20, %v204_v19  ;;  %v216_v34 = vld [vmem:[#allocation5 + $0x4a0] sm:$0xff]  ;;  %v214_v35 = vld [vmem:[#allocation5 + $0x490] sm:$0xff] }
  0x6b   :  { %v225_v39 = vld [vmem:[#allocation5 + $0x4e8] sm:$0xff]  ;;  %v223_v40 = vld [vmem:[#allocation5 + $0x4d8] sm:$0xff]  ;;  %v220_v47 = vld [vmem:[#allocation5 + $0x4c0] sm:$0xff] }
  0x6c   :  { %868 = vmatpush1.bf16.msra.mxu0 %v867_v31  ;;  %v987_v31 = vpack.c.bf16 %v210_v23, %v206_v21  ;;  %v227_v41 = vld [vmem:[#allocation5 + $0x4f8] sm:$0xff]  ;;  %v65_v42 = vld [vmem:[#allocation2 + $0x48] sm:$0xff]  ;;  %v893_v46 = vpack.c.bf16 %v225_v39, %v221_v38  ;;  %v224_v48 = vld [vmem:[#allocation5 + $0x4e0] sm:$0xff] }
  0x6d   :  { %968 = vmatpush1.bf16.msra.mxu1 %v967_v32  ;;  %870 = vmatprep.subr.bf16.mxu0 %v869_v33  ;;  %v889_v32 = vpack.c.bf16 %v217_v25, %v213_v24  ;;  %v212_v33 = vld [vmem:[#allocation5 + $0x480] sm:$0xff]  ;;  %v993_v50 = vpack.c.bf16 %v227_v41, %v223_v40  ;;  %v226_v51 = vld [vmem:[#allocation5 + $0x4f0] sm:$0xff]  ;;  %v229_v52 = vld [vmem:[#allocation5 + $0x508] sm:$0xff] }
  0x6e   :  { %970 = vmatprep.subr.bf16.mxu1 %v969_v37  ;;  %v218_v37 = vld [vmem:[#allocation5 + $0x4b0] sm:$0xff]  ;;  %v233_v53 = vld [vmem:[#allocation5 + $0x528] sm:$0xff]  ;;  %v231_v54 = vld [vmem:[#allocation5 + $0x518] sm:$0xff] }
  0x6f   :  { %v897_v59 = vpack.c.bf16 %v233_v53, %v229_v52  ;;  %v228_v60 = vld [vmem:[#allocation5 + $0x500] sm:$0xff]  ;;  %v230_v62 = vld [vmem:[#allocation5 + $0x510] sm:$0xff]  ;;  %v237_v1 = vld [vmem:[#allocation5 + $0x548] sm:$0xff] }
  0x70   :  { %872 = vmatpush1.bf16.msra.mxu0 %v871_v43  ;;  %v891_v43 = vpack.c.bf16 %v216_v34, %v212_v33  ;;  %v234_v0 = vld [vmem:[#allocation5 + $0x530] sm:$0xff]  ;;  %v241_v2 = vld [vmem:[#allocation5 + $0x568] sm:$0xff]  ;;  %v236_v8 = vld [vmem:[#allocation5 + $0x540] sm:$0xff] }
  0x71   :  { %972 = vmatpush1.bf16.msra.mxu1 %v971_v44  ;;  %874 = vmatprep.subr.bf16.mxu0 %v873_v45  ;;  %v64_v44 = vld [vmem:[#allocation2 + $0x40] sm:$0xff]  ;;  %v991_v45 = vpack.c.bf16 %v218_v37, %v214_v35  ;;  %v999_v6 = vpack.c.bf16 %v234_v0, %v230_v62  ;;  %v901_v7 = vpack.c.bf16 %v241_v2, %v237_v1  ;;  %v238_v10 = vld [vmem:[#allocation5 + $0x550] sm:$0xff]  ;;  %v245_v13 = vld [vmem:[#allocation5 + $0x588] sm:$0xff] }
  0x72   :  { %974 = vmatprep.subr.bf16.mxu1 %v973_v49  ;;  %v222_v49 = vld [vmem:[#allocation5 + $0x4d0] sm:$0xff]  ;;  %v249_v14 = vld [vmem:[#allocation5 + $0x5a8] sm:$0xff]  ;;  %v244_v20 = vld [vmem:[#allocation5 + $0x580] sm:$0xff] }
  0x73   :  { %v995_v58 = vpack.c.bf16 %v226_v51, %v222_v49  ;;  %v242_v12 = vld [vmem:[#allocation5 + $0x570] sm:$0xff]  ;;  %v905_v19 = vpack.c.bf16 %v249_v14, %v245_v13  ;;  %v248_v21 = vld [vmem:[#allocation5 + $0x5a0] sm:$0xff]  ;;  %v253_v25 = vld [vmem:[#allocation5 + $0x5c8] sm:$0xff] }
  0x74   :  { %876 = vmatpush1.bf16.msra.mxu0 %v875_v55  ;;  %v235_v55 = vld [vmem:[#allocation5 + $0x538] sm:$0xff]  ;;  %v250_v24 = vld [vmem:[#allocation5 + $0x5b0] sm:$0xff]  ;;  %v257_v26 = vld [vmem:[#allocation5 + $0x5e8] sm:$0xff] }
  0x75   :  { %976 = vmatpush1.bf16.msra.mxu1 %v975_v56  ;;  %878 = vmatprep.subr.bf16.mxu0 %v877_v57  ;;  %v59_v56 = vld [vmem:[#allocation2 + $0x18] sm:$0xff]  ;;  %v895_v57 = vpack.c.bf16 %v224_v48, %v220_v47  ;;  %v997_v63 = vpack.c.bf16 %v235_v55, %v231_v54  ;;  %v256_v33 = vld [vmem:[#allocation5 + $0x5e0] sm:$0xff]  ;;  %v254_v34 = vld [vmem:[#allocation5 + $0x5d0] sm:$0xff] }
  0x76   :  { %978 = vmatprep.subr.bf16.mxu1 %v977_v61  ;;  %v232_v61 = vld [vmem:[#allocation5 + $0x520] sm:$0xff]  ;;  %v255_v27 = vld [vmem:[#allocation5 + $0x5d8] sm:$0xff]  ;;  %v261_v37 = vld [vmem:[#allocation5 + $0x608] sm:$0xff] }
  0x77   :  { %v265_v38 = vld [vmem:[#allocation5 + $0x628] sm:$0xff]  ;;  %v263_v39 = vld [vmem:[#allocation5 + $0x618] sm:$0xff]  ;;  %v266_v48 = vld [vmem:[#allocation5 + $0x630] sm:$0xff] }
  0x78   :  { %880 = vmatpush1.bf16.msra.mxu0 %v879_v3  ;;  %v239_v3 = vld [vmem:[#allocation5 + $0x558] sm:$0xff]  ;;  %v644_v49 = vld [vmem:[#allocation7 + $0x80] sm:$0xff]  ;;  %v629_v55 = vld [vmem:[#allocation7 + $0x8] sm:$0xff] }
  0x79   :  { %980 = vmatpush1.bf16.msra.mxu1 %v979_v4  ;;  %882 = vmatprep.subr.bf16.mxu0 %v881_v5  ;;  %v243_v4 = vld [vmem:[#allocation5 + $0x578] sm:$0xff]  ;;  %v899_v5 = vpack.c.bf16 %v232_v61, %v228_v60  ;;  %v628_v54 = vld [vmem:[#allocation7] sm:$0xff]  ;;  %v630_v62 = vld [vmem:[#allocation7 + $0x10] sm:$0xff] }
  0x7a   :  { %982 = vmatprep.subr.bf16.mxu1 %v981_v9  ;;  %v240_v9 = vld [vmem:[#allocation5 + $0x560] sm:$0xff]  ;;  %v1001_v11 = vpack.c.bf16 %v243_v4, %v239_v3  ;;  %v267_v40 = vld [vmem:[#allocation5 + $0x638] sm:$0xff]  ;;  %v1019_v60 = vpack.c.bf16 %v629_v55, %v628_v54  ;;  %v649_v1 = vld [vmem:[#allocation7 + $0xa8] sm:$0xff] }
  0x7b   :  { %343 = vmatmul.mubr.f32.vlgmr.msra.gmra.mrb[0].mxu0 %v56_v15  ;;  %v1013_v47 = vpack.c.bf16 %v267_v40, %v263_v39  ;;  %v648_v0 = vld [vmem:[#allocation7 + $0xa0] sm:$0xff]  ;;  %v62_v2 = vld [vmem:[#allocation2 + $0x30] sm:$0xff]  ;;  %v67_v3 = vld [vmem:[#allocation2 + $0x58] sm:$0xff] }
  0x7c   :  { %884 = vmatpush1.bf16.msra.mxu0 %v883_v16  ;;  %509 = vmatmul.mubr.f32.vlgmr.msra.gmra.mrb[0].mxu1 %v56_v15  ;;  %v247_v15 = vld [vmem:[#allocation5 + $0x598] sm:$0xff]  ;;  %v634_v13 = vld [vmem:[#allocation7 + $0x30] sm:$0xff] }
  0x7d   :  { %984 = vmatpush1.bf16.msra.mxu1 %v983_v17  ;;  %886 = vmatprep.subr.bf16.mxu0 %v885_v18  ;;  %v251_v16 = vld [vmem:[#allocation5 + $0x5b8] sm:$0xff]  ;;  %v903_v17 = vpack.c.bf16 %v240_v9, %v236_v8  ;;  %v1003_v18 = vpack.c.bf16 %v242_v12, %v238_v10  ;;  %v650_v8 = vld [vmem:[#allocation7 + $0xb0] sm:$0xff] }
  0x7e   :  { %986 = vmatprep.subr.bf16.mxu1 %v985_v22  ;;  %348 = vmatprep.mubr.f32.mxu0 %v61_v28  ;;  %v246_v22 = vld [vmem:[#allocation5 + $0x590] sm:$0xff]  ;;  %v1005_v23 = vpack.c.bf16 %v251_v16, %v247_v15  ;;  %v651_v9 = vld [vmem:[#allocation7 + $0xb8] sm:$0xff]  ;;  %v652_v15 = vld [vmem:[#allocation7 + $0xc0] sm:$0xff] }
  0x7f   :  { %514 = vmatprep.mubr.f32.mxu1 %v61_v28  ;;  %349 = vmatmul.mubr.f32.gmra.mrb[2].mxu0 %v60_v30  ;;  %v259_v28 = vld [vmem:[#allocation5 + $0x5f8] sm:$0xff]  ;;  %v66_v10 = vld [vmem:[#allocation2 + $0x50] sm:$0xff]  ;;  %v1029_v12 = vpack.c.bf16 %v651_v9, %v650_v8  ;;  %v653_v16 = vld [vmem:[#allocation7 + $0xc8] sm:$0xff] }
  0x80   :  { %888 = vmatpush1.bf16.msra.mxu0 %v887_v29  ;;  %515 = vmatmul.mubr.f32.gmra.mrb[2].mxu1 %v60_v30  ;;  %v907_v29 = vpack.c.bf16 %v248_v21, %v244_v20  ;;  %v1007_v30 = vpack.c.bf16 %v250_v24, %v246_v22  ;;  %v1009_v35 = vpack.c.bf16 %v259_v28, %v255_v27  ;;  %v635_v14 = vld [vmem:[#allocation7 + $0x38] sm:$0xff]  ;;  %v637_v20 = vld [vmem:[#allocation7 + $0x48] sm:$0xff]  ;;  %v654_v21 = vld [vmem:[#allocation7 + $0xd0] sm:$0xff] }
  0x81   :  { %988 = vmatpush1.bf16.msra.mxu1 %v987_v31  ;;  %890 = vmatprep.subr.bf16.mxu0 %v889_v32  ;;  %v909_v31 = vpack.c.bf16 %v257_v26, %v253_v25  ;;  %v252_v32 = vld [vmem:[#allocation5 + $0x5c0] sm:$0xff]  ;;  %v655_v22 = vld [vmem:[#allocation7 + $0xd8] sm:$0xff]  ;;  %v638_v25 = vld [vmem:[#allocation7 + $0x50] sm:$0xff] }
  0x82   :  { %990 = vmatprep.subr.bf16.mxu1 %v989_v36  ;;  %354 = vmatprep.mubr.f32.mxu0 %v65_v42  ;;  %v258_v36 = vld [vmem:[#allocation5 + $0x5f0] sm:$0xff]  ;;  %v911_v41 = vpack.c.bf16 %v256_v33, %v252_v32  ;;  %v1037_v24 = vpack.c.bf16 %v655_v22, %v654_v21  ;;  %v639_v26 = vld [vmem:[#allocation7 + $0x58] sm:$0xff]  ;;  %v656_v27 = vld [vmem:[#allocation7 + $0xe0] sm:$0xff] }
  0x83   :  { %520 = vmatprep.mubr.f32.mxu1 %v65_v42  ;;  %355 = vmatmul.mubr.f32.gmra.mrb[4].mxu0 %v64_v44  ;;  %v1011_v42 = vpack.c.bf16 %v258_v36, %v254_v34  ;;  %v657_v28 = vld [vmem:[#allocation7 + $0xe8] sm:$0xff]  ;;  %v658_v34 = vld [vmem:[#allocation7 + $0xf0] sm:$0xff] }
  0x84   :  { %892 = vmatpush1.bf16.msra.mxu0 %v891_v43  ;;  %521 = vmatmul.mubr.f32.gmra.mrb[4].mxu1 %v64_v44  ;;  %v913_v43 = vpack.c.bf16 %v265_v38, %v261_v37  ;;  %v260_v44 = vld [vmem:[#allocation5 + $0x600] sm:$0xff]  ;;  %v641_v32 = vld [vmem:[#allocation7 + $0x68] sm:$0xff]  ;;  %v642_v37 = vld [vmem:[#allocation7 + $0x70] sm:$0xff] }
  0x85   :  { %992 = vmatpush1.bf16.msra.mxu1 %v991_v45  ;;  %894 = vmatprep.subr.bf16.mxu0 %v893_v46  ;;  %v264_v45 = vld [vmem:[#allocation5 + $0x620] sm:$0xff]  ;;  %v262_v46 = vld [vmem:[#allocation5 + $0x610] sm:$0xff]  ;;  %v643_v38 = vld [vmem:[#allocation7 + $0x78] sm:$0xff] }
  0x86   :  { %994 = vmatprep.subr.bf16.mxu1 %v993_v50  ;;  %770 = vmatprep.mubr.msk.f32.mxu0 %vm268_vm0, %v59_v56  ;;  %v645_v50 = vld [vmem:[#allocation7 + $0x88] sm:$0xff]  ;;  %v915_v51 = vpack.c.bf16 %v264_v45, %v260_v44  ;;  %v1015_v52 = vpack.c.bf16 %v266_v48, %v262_v46  ;;  %v1047_v39 = vpack.c.bf16 %v643_v38, %v642_v37 }
  0x87   :  { %773 = vmatprep.mubr.msk.f32.mxu1 %vm268_vm0, %v59_v56  ;;  %v1017_v53 = vpack.c.bf16 %v645_v50, %v644_v49  ;;  %v646_v56 = vld [vmem:[#allocation7 + $0x90] sm:$0xff] }
  0x88   :  { %896 = vmatpush1.bf16.msra.mxu0 %v895_v57  ;;  %v647_v57 = vld [vmem:[#allocation7 + $0x98] sm:$0xff] }
  0x89   :  { %996 = vmatpush1.bf16.msra.mxu1 %v995_v58  ;;  %898 = vmatprep.subr.bf16.mxu0 %v897_v59  ;;  %v58_v58 = vld [vmem:[#allocation2 + $0x10] sm:$0xff]  ;;  %v63_v59 = vld [vmem:[#allocation2 + $0x38] sm:$0xff]  ;;  %v1021_v61 = vpack.c.bf16 %v647_v57, %v646_v56 }
  0x8a   :  { %998 = vmatprep.subr.bf16.mxu1 %v997_v63  ;;  %v631_v63 = vld [vmem:[#allocation7 + $0x18] sm:$0xff] }
  0x8b   :  { %v1023_v4 = vpack.c.bf16 %v631_v63, %v630_v62 }
  0x8c   :  { %900 = vmatpush1.bf16.msra.mxu0 %v899_v5  ;;  %v1025_v5 = vpack.c.bf16 %v649_v1, %v648_v0 }
  0x8d   :  { %1000 = vmatpush1.bf16.msra.mxu1 %v999_v6  ;;  %902 = vmatprep.subr.bf16.mxu0 %v901_v7  ;;  %v632_v6 = vld [vmem:[#allocation7 + $0x20] sm:$0xff]  ;;  %v633_v7 = vld [vmem:[#allocation7 + $0x28] sm:$0xff] }
  0x8e   :  { %1002 = vmatprep.subr.bf16.mxu1 %v1001_v11  ;;  %v1027_v11 = vpack.c.bf16 %v633_v7, %v632_v6 }
  0x90   :  { %904 = vmatpush1.bf16.msra.mxu0 %v903_v17  ;;  %v1031_v17 = vpack.c.bf16 %v635_v14, %v634_v13 }
  0x91   :  { %1004 = vmatpush1.bf16.msra.mxu1 %v1003_v18  ;;  %906 = vmatprep.subr.bf16.mxu0 %v905_v19  ;;  %v1033_v18 = vpack.c.bf16 %v653_v16, %v652_v15  ;;  %v636_v19 = vld [vmem:[#allocation7 + $0x40] sm:$0xff] }
  0x92   :  { %1006 = vmatprep.subr.bf16.mxu1 %v1005_v23  ;;  %v1035_v23 = vpack.c.bf16 %v637_v20, %v636_v19 }
  0x94   :  { %908 = vmatpush1.bf16.msra.mxu0 %v907_v29  ;;  %v1039_v29 = vpack.c.bf16 %v639_v26, %v638_v25 }
  0x95   :  { %1008 = vmatpush1.bf16.msra.mxu1 %v1007_v30  ;;  %910 = vmatprep.subr.bf16.mxu0 %v909_v31  ;;  %v1041_v30 = vpack.c.bf16 %v657_v28, %v656_v27  ;;  %v640_v31 = vld [vmem:[#allocation7 + $0x60] sm:$0xff] }
  0x96   :  { %1010 = vmatprep.subr.bf16.mxu1 %v1009_v35  ;;  %v1043_v33 = vpack.c.bf16 %v641_v32, %v640_v31  ;;  %v659_v35 = vld [vmem:[#allocation7 + $0xf8] sm:$0xff] }
  0x97   :  { %v1045_v36 = vpack.c.bf16 %v659_v35, %v658_v34 }
  0x98   :  { %912 = vmatpush1.bf16.msra.mxu0 %v911_v41 }
  0x99   :  { %1012 = vmatpush1.bf16.msra.mxu1 %v1011_v42  ;;  %914 = vmatprep.subr.bf16.mxu0 %v913_v43 }
  0x9a   :  { %1014 = vmatprep.subr.bf16.mxu1 %v1013_v47 }
  0x9c   :  { %916 = vmatpush1.bf16.msra.mxu0 %v915_v51 }
  0x9d   :  { %1016 = vmatpush1.bf16.msra.mxu1 %v1015_v52  ;;  %1018 = vmatprep.subr.bf16.mxu0 %v1017_v53 }
  0x9e   :  { %1049 = vmatprep.subr.bf16.mxu1 %v1017_v53 }
  0x9f   :  { %426 = vmatmul.mubr.f32.vlgmr.msra.gmra.mrb[0].mxu0 %v58_v58 }
  0xa0   :  { %592 = vmatmul.mubr.f32.vlgmr.msra.gmra.mrb[0].mxu1 %v58_v58  ;;  %771 = vmatprep.mubr.msk.f32.mxu0 %vm268_vm0, %v63_v59 }
  0xa1   :  { %774 = vmatprep.mubr.msk.f32.mxu1 %vm268_vm0, %v63_v59  ;;  %1020 = vmatpush3.bf16.msra.mxu0 %v1019_v60 }
  0xa2   :  { %1022 = vmatprep.subr.bf16.mxu0 %v1021_v61  ;;  %1057 = vmatpush3.bf16.msra.mxu1 %v1019_v60 }
  0xa3   :  { %432 = vmatmul.mubr.f32.gmra.mrb[2].mxu0 %v62_v2  ;;  %1050 = vmatprep.subr.bf16.mxu1 %v1021_v61 }
  0xa4   :  { %598 = vmatmul.mubr.f32.gmra.mrb[2].mxu1 %v62_v2  ;;  %772 = vmatprep.mubr.msk.f32.mxu0 %vm268_vm0, %v67_v3 }
  0xa5   :  { %775 = vmatprep.mubr.msk.f32.mxu1 %vm268_vm0, %v67_v3  ;;  %1024 = vmatpush3.bf16.msra.mxu0 %v1023_v4 }
  0xa6   :  { %1026 = vmatprep.subr.bf16.mxu0 %v1025_v5  ;;  %1058 = vmatpush3.bf16.msra.mxu1 %v1023_v4 }
  0xa7   :  { %438 = vmatmul.mubr.f32.gmra.mrb[4].mxu0 %v66_v10  ;;  %1051 = vmatprep.subr.bf16.mxu1 %v1025_v5 }
  0xa8   :  { %604 = vmatmul.mubr.f32.gmra.mrb[4].mxu1 %v66_v10 }
  0xa9   :  { %1028 = vmatpush3.bf16.msra.mxu0 %v1027_v11 }
  0xaa   :  { %1030 = vmatprep.subr.bf16.mxu0 %v1029_v12  ;;  %1059 = vmatpush3.bf16.msra.mxu1 %v1027_v11 }
  0xab   :  { %1052 = vmatprep.subr.bf16.mxu1 %v1029_v12 }
  0xad   :  { %1032 = vmatpush3.bf16.msra.mxu0 %v1031_v17 }
  0xae   :  { %1034 = vmatprep.subr.bf16.mxu0 %v1033_v18  ;;  %1060 = vmatpush3.bf16.msra.mxu1 %v1031_v17 }
  0xaf   :  { %1053 = vmatprep.subr.bf16.mxu1 %v1033_v18 }
  0xb1   :  { %1036 = vmatpush3.bf16.msra.mxu0 %v1035_v23 }
  0xb2   :  { %1038 = vmatprep.subr.bf16.mxu0 %v1037_v24  ;;  %1061 = vmatpush3.bf16.msra.mxu1 %v1035_v23 }
  0xb3   :  { %1054 = vmatprep.subr.bf16.mxu1 %v1037_v24 }
  0xb5   :  { %1040 = vmatpush3.bf16.msra.mxu0 %v1039_v29 }
  0xb6   :  { %1042 = vmatprep.subr.bf16.mxu0 %v1041_v30  ;;  %1062 = vmatpush3.bf16.msra.mxu1 %v1039_v29 }
  0xb7   :  { %1055 = vmatprep.subr.bf16.mxu1 %v1041_v30 }
  0xb9   :  { %1044 = vmatpush3.bf16.msra.mxu0 %v1043_v33 }
  0xba   :  { %1063 = vmatpush3.bf16.msra.mxu1 %v1043_v33  ;;  %1046 = vmatprep.subr.bf16.mxu0 %v1045_v36 }
  0xbb   :  { %1056 = vmatprep.subr.bf16.mxu1 %v1045_v36 }
  0xbd   :  { %1048 = vmatpush3.bf16.msra.mxu0 %v1047_v39 }
  0xbe   :  { %1064 = vmatpush3.bf16.msra.mxu1 %v1047_v39 }
 0x172   :  { %v427_v40 = vpop.f32.mrb[0].mxu0 }
 0x173   :  { %v610_v41 = vmul.f32 %v427_v40, %v427_v40  ;;  %v593_v42 = vpop.f32.mrb[0].mxu1  ;;  %v429_v43 = vpop.f32.mrb[1].mxu0 }
 0x174   :  { %v616_v44 = vmul.f32 %v593_v42, %v593_v42  ;;  %v611_v45 = vmul.f32 %v429_v43, %v429_v43  ;;  %v595_v46 = vpop.f32.mrb[1].mxu1 }
 0x175   :  { %v617_v47 = vmul.f32 %v595_v46, %v595_v46 }
 0x176   :  { %v622_v48 = vadd.f32 %v616_v44, %v610_v41  ;;  %v433_v49 = vpop.f32.mrb[2].mxu0 }
 0x177   :  { %v623_v50 = vadd.f32 %v617_v47, %v611_v45  ;;  %v612_v51 = vmul.f32 %v433_v49, %v433_v49  ;;  %v599_v52 = vpop.f32.mrb[2].mxu1  ;;  %v435_v53 = vpop.f32.mrb[3].mxu0 }
 0x178   :  { %v618_v54 = vmul.f32 %v599_v52, %v599_v52  ;;  %v613_v55 = vmul.f32 %v435_v53, %v435_v53  ;;  %v601_v56 = vpop.f32.mrb[3].mxu1 }
 0x179   :  { %v619_v57 = vmul.f32 %v601_v56, %v601_v56  ;;  %724 = vmatprep.mubr.f32.mxu0 %v623_v50 }
 0x17a   :  { %v624_v58 = vadd.f32 %v618_v54, %v612_v51  ;;  %725 = vmatmul.mubr.f32.vlgmr.msra.gmra.mrb[6].mxu0 %v622_v48  ;;  %v439_v59 = vpop.f32.mrb[4].mxu0 }
 0x17b   :  { %v625_v60 = vadd.f32 %v619_v57, %v613_v55  ;;  %v614_v61 = vmul.f32 %v439_v59, %v439_v59  ;;  %v605_v62 = vpop.f32.mrb[4].mxu1  ;;  %v441_v63 = vpop.f32.mrb[5].mxu0 }
 0x17c   :  { %v620_v0 = vmul.f32 %v605_v62, %v605_v62  ;;  %v615_v1 = vmul.f32 %v441_v63, %v441_v63  ;;  %v607_v2 = vpop.f32.mrb[5].mxu1 }
 0x17d   :  { %v621_v3 = vmul.f32 %v607_v2, %v607_v2  ;;  %729 = vmatprep.mubr.f32.mxu1 %v625_v60 }
 0x17e   :  { %v626_v4 = vadd.f32 %v620_v0, %v614_v61  ;;  %730 = vmatmul.mubr.f32.vlgmr.msra.gmra.mrb[6].mxu1 %v624_v58 }
 0x17f   :  { %v627_v5 = vadd.f32 %v621_v3, %v615_v1 }
 0x181   :  { %734 = vmatprep.mubr.f32.mxu1 %v627_v5 }
 0x182   :  { %735 = vmatmul.mubr.f32.gmra.mrb[8].mxu1 %v626_v4 }
 0x24d   :  { %v808_v6 = vpop.f32.mrb[6].mxu0 }
 0x24e   :  { %v809_v7 = vpop.f32.mrb[7].mxu0 }
 0x24f   :  { %v810_v8 = vadd.f32 %v809_v7, %v808_v6 }
 0x251   :  { %v727_v9 = vadd.f32 1e-06, %v810_v8  ;;  %v811_v10 = vpop.f32.mrb[6].mxu1 }
 0x252   :  { %v812_v11 = vpop.f32.mrb[7].mxu1 }
 0x253   :  { %1085 = vlog2.f32 %v727_v9  ;;  %v813_v12 = vadd.f32 %v812_v11, %v811_v10 }
 0x255   :  { %v732_v13 = vadd.f32 1e-06, %v813_v12  ;;  %v814_v14 = vpop.f32.mrb[8].mxu1 }
 0x256   :  { %v815_v15 = vpop.f32.mrb[9].mxu1 }
 0x257   :  { %1087 = vlog2.f32 %v732_v13  ;;  %v816_v16 = vadd.f32 %v815_v15, %v814_v14 }
 0x259   :  { %v737_v17 = vadd.f32 1e-06, %v816_v16 }
 0x25b   :  { %1089 = vlog2.f32 %v737_v17 }
 0x25d   :  { %v1086_v18 = vpop.eup %1085 }
 0x25e   :  { %v741_v19 = vmul.f32 0.6931472, %v1086_v18 }
 0x260   :  { %v746_v20 = vmul.f32 0.4342945, %v741_v19 }
 0x261   :  { %v1088_v21 = vpop.eup %1087 }
 0x262   :  { %749 = vst [vmem:[#allocation8] sm:$0xff] %v746_v20  ;;  %v743_v22 = vmul.f32 0.6931472, %v1088_v21 }
 0x264   :  { %v747_v23 = vmul.f32 0.4342945, %v743_v22 }
 0x265   :  { %v1090_v24 = vpop.eup %1089 }
 0x266   :  { %750 = vst [vmem:[#allocation8 + $0x8] sm:$0xff] %v747_v23  ;;  %v745_v25 = vmul.f32 0.6931472, %v1090_v24 }
 0x268   :  { %v748_v26 = vmul.f32 0.4342945, %v745_v25 }
 0x26a   :  { %751 = vst [vmem:[#allocation8 + $0x10] sm:$0xff] %v748_v26 }
 0x26b   :  { %1168 = shalt.err (!%p1165_p0)
}
 0x26c   :  { %s1169_s27 = scalar_lea.hbm %s1283_s3, 384 }
 0x26d   :  { %p1170_p1 = scmp.ne.s32.totalorder %s1283_s3, %s1169_s27  ;;  %p1173_p2 = scmp.lt.u32.totalorder %s1169_s27, %s1283_s3 }
 0x26f   :  { %p1175_p3 = pnand %p1173_p2, %p1170_p1 }
 0x271   :  { %1178 = shalt.err (!%p1175_p3)
}
 0x272   :  { %763 = dma.vmem_to_hbm [thread:$0]  %s758_s23, 384, %s1283_s3, [#allocation4], %s1190_s0, %s1190_s0, %s1191_s15  }
 0x273   :  { %1183 = dma.done.wait [#allocation4], 384  }
 0x274   :  { %1184 = vsyncadd [#allocation4], 4294966912 }
 0x275   :  { %767 = vsyncpa [#allocation3], 1 }
 0x276   :  { %768 = vsyncpa [#allocation6], 1 }
 0x277   :  { %769 = vsyncpa [#allocation4], 1 }

</bundles_post_ra>
